<compile_context>
chip_gen: v7x
topology: tpu7x:2x2x1
jax: 0.10.0
libtpu: 0.0.40
codegen_flags: <defaults>
</compile_context>

<pallas_src>
import functools

import jax
import jax.numpy as jnp
from jax import lax
from jax.experimental import pallas as pl
from jax.experimental.pallas import tpu as pltpu


def _sepconv_kernel(x_ref, w_ref, m_ref, o_ref, taps_ref, *, W, HW, Cin):
    # x_ref:    (nb, Cin, H*W)     lane-dense input slab
    # w_ref:    (Cout, 9*Cin+1)    folded dw*BN*pw tap weights + bias column
    # m_ref:    (9, 1, H*W)        0/1 halo masks per tap
    # o_ref:    (nb, Cout, H*W)
    # taps_ref: VMEM scratch (9*Cin+1, H*W) — stacked taps + ones row
    nb = x_ref.shape[0]
    n_tap_rows = 9 * Cin

    # Hoisted small loads (issued once per grid step, reused across images).
    w = w_ref[...]                                   # (Cout, 9*Cin+1)
    halo = [m_ref[t] for t in range(9)]              # each (1, H*W)

    # Constant "ones" row: makes the bias column of `w` act as an additive
    # bias inside the matmul (no separate VPU broadcast + add).
    taps_ref[pl.ds(n_tap_rows, 1), :] = jnp.ones((1, HW), jnp.float32)

    offsets = [(kh - 1, kw - 1) for kh in range(3) for kw in range(3)]

    for b in range(nb):
        xb = x_ref[b].astype(jnp.float32)            # (Cin, H*W)
        for t, (dh, dw) in enumerate(offsets):
            shift = dh * W + dw                      # flattened spatial offset
            if shift == 0:
                tap = xb
            else:
                # tap[:, h*W+w] = x[:, (h+dh)*W+(w+dw)] (cyclic); the mask
                # zeroes out-of-image (halo) positions.  Roll runs on XLU.
                tap = pltpu.roll(xb, shift=(-shift) % HW, axis=1) * halo[t]
            taps_ref[pl.ds(t * Cin, Cin), :] = tap   # static sublane offsets
        # One MXU matmul per image covers all taps, BN scaling, pointwise
        # mixing and the bias.
        o_ref[b] = jnp.dot(w, taps_ref[...],
                           preferred_element_type=jnp.float32).astype(o_ref.dtype)


def separable_conv2d(x, w_dw, w_pw, gamma, beta, running_mean, running_var,
                     eps=1e-5, block_n=None):
    """Fused SeparableConv2d forward (kernel_size=3, stride=1, padding=1,
    dilation=1, bias=False; BatchNorm in eval mode).

    x: (N, Cin, H, W) f32 NCHW; w_dw: (Cin, 3, 3); w_pw: (Cout, Cin).
    Returns (N, Cout, H, W) f32.
    """
    N, Cin, H, W = x.shape
    Cout = w_pw.shape[0]
    assert w_dw.shape == (Cin, 3, 3), "kernel hardcodes 3x3/stride1/pad1/dil1"
    HW = H * W
    f32 = jnp.float32

    # --- fold BN (eval) + depthwise weights into per-tap pointwise weights ---
    scale = (gamma / jnp.sqrt(running_var + eps)).astype(f32)            # (Cin,)
    shift = beta.astype(f32) - running_mean.astype(f32) * scale          # (Cin,)
    w_pw_s = w_pw.astype(f32) * scale[None, :]                           # (Cout, Cin)
    w_dw_t = jnp.transpose(w_dw.astype(f32), (1, 2, 0)).reshape(9, Cin)  # (9, Cin)
    w_taps = w_pw_s[:, None, :] * w_dw_t[None, :, :]                     # (Cout, 9, Cin)
    bias = (w_pw.astype(f32) @ shift).reshape(Cout, 1)                   # (Cout, 1)
    # Weight matrix for the single fused matmul: tap columns + bias column.
    w_full = jnp.concatenate([w_taps.reshape(Cout, 9 * Cin), bias], axis=1)

    # --- precomputed 0/1 halo masks over the flattened spatial axis ---
    hh = jnp.arange(H)[:, None]
    ww = jnp.arange(W)[None, :]
    mask_list = []
    for kh in range(3):
        for kw in range(3):
            dh, dw = kh - 1, kw - 1
            ok = ((hh + dh >= 0) & (hh + dh < H) &
                  (ww + dw >= 0) & (ww + dw < W))                        # (H, W)
            mask_list.append(ok.reshape(1, HW))
    masks = jnp.stack(mask_list, axis=0).astype(f32)                     # (9, 1, HW)

    # --- lane-dense views (free reshape; no pad / transpose in HBM) ---
    x_flat = x.reshape(N, Cin, HW)

    if block_n is None:
        block_n = min(N, 8)              # a few images per grid step
    block_n = max(1, min(block_n, N))
    # Partial last block is safe: batch rows are independent and out-of-range
    # output rows are dropped by Pallas.
    grid = (pl.cdiv(N, block_n),)

    kernel = functools.partial(_sepconv_kernel, W=W, HW=HW, Cin=Cin)

    out_flat = pl.pallas_call(
        kernel,
        out_shape=jax.ShapeDtypeStruct((N, Cout, HW), f32),
        grid_spec=pltpu.PrefetchScalarGridSpec(
            num_scalar_prefetch=0,
            grid=grid,
            in_specs=[
                pl.BlockSpec((block_n, Cin, HW), lambda n: (n, 0, 0)),
                pl.BlockSpec((Cout, 9 * Cin + 1), lambda n: (0, 0)),
                pl.BlockSpec((9, 1, HW), lambda n: (0, 0, 0)),
            ],
            out_specs=pl.BlockSpec((block_n, Cout, HW), lambda n: (n, 0, 0)),
            scratch_shapes=[pltpu.VMEM((9 * Cin + 1, HW), f32)],
        ),
        compiler_params=pltpu.CompilerParams(
            dimension_semantics=("parallel",)),
    )(x_flat, w_full, masks)

    return out_flat.reshape(N, Cout, H, W)


def _reference(x, w_dw, w_pw, gamma, beta, running_mean, running_var, eps=1e-5):
    N, Cin, H, W = x.shape
    Cout = w_pw.shape[0]
    dn = ("NCHW", "OIHW", "NCHW")
    y = lax.conv_general_dilated(
        x, w_dw.reshape(Cin, 1, 3, 3), window_strides=(1, 1),
        padding=((1, 1), (1, 1)), dimension_numbers=dn,
        feature_group_count=Cin)
    y = (y - running_mean[None, :, None, None]) / jnp.sqrt(
        running_var[None, :, None, None] + eps)
    y = y * gamma[None, :, None, None] + beta[None, :, None, None]
    y = lax.conv_general_dilated(
        y, w_pw.reshape(Cout, Cin, 1, 1), window_strides=(1, 1),
        padding=((0, 0), (0, 0)), dimension_numbers=dn)
    return y


if __name__ == "__main__":
    # Module config: inplanes=4, planes=8, kernel_size=3, stride=1, padding=1,
    # dilation=1, bias=False.
    N, Cin, H, W = 2, 4, 16, 16
    Cout = 8

    key = jax.random.PRNGKey(0)
    k0, k1, k2, k3, k4, k5, k6 = jax.random.split(key, 7)

    x = jax.random.normal(k0, (N, Cin, H, W), dtype=jnp.float32)
    # conv1: (inplanes, 1, 3, 3) depthwise weights -> stored as (Cin, 3, 3)
    w_dw = jax.random.normal(k1, (Cin, 3, 3), dtype=jnp.float32) * 0.2
    # pointwise: (planes, inplanes, 1, 1) -> stored as (Cout, Cin)
    w_pw = jax.random.normal(k2, (Cout, Cin), dtype=jnp.float32) * 0.2
    # BatchNorm2d(inplanes) parameters / running stats.
    gamma = 1.0 + 0.1 * jax.random.normal(k3, (Cin,), dtype=jnp.float32)
    beta = 0.1 * jax.random.normal(k4, (Cin,), dtype=jnp.float32)
    running_mean = 0.1 * jax.random.normal(k5, (Cin,), dtype=jnp.float32)
    running_var = jax.random.uniform(k6, (Cin,), dtype=jnp.float32,
                                     minval=0.5, maxval=1.5)

    out = separable_conv2d(x, w_dw, w_pw, gamma, beta, running_mean, running_var)
    out = jax.block_until_ready(out)

    ref = _reference(x, w_dw, w_pw, gamma, beta, running_mean, running_var)
    assert out.shape == (N, Cout, H, W)
    assert jnp.allclose(out, ref, atol=1e-4, rtol=1e-4), "mismatch vs reference"

    print("KERNEL_OK")
</pallas_src>

<mosaic_0001>
module attributes {stable_mosaic.version = 11 : i64} {
  func.func @_sepconv_kernel(%arg0: i32, %arg1: memref<2x4x256xf32, #tpu.memory_space<vmem>>, %arg2: memref<8x37xf32, #tpu.memory_space<vmem>>, %arg3: memref<9x1x256xf32, #tpu.memory_space<vmem>>, %arg4: memref<2x8x256xf32, #tpu.memory_space<vmem>>, %arg5: memref<37x256xf32, #tpu.memory_space<vmem>>) attributes {dimension_semantics = [#tpu.dimension_semantics<parallel>], iteration_bounds = array<i64: 1>, scalar_prefetch = 0 : i64, scratch_operands = 1 : i64, tpu.core_type = #tpu.core_type<tc>, window_params = [{transform_indices = @transform_0, window_bounds = array<i64: 2, 4, 256>}, {pipeline_mode = #tpu.pipeline_mode<synchronous>, transform_indices = @transform_1, window_bounds = array<i64: 8, 37>}, {pipeline_mode = #tpu.pipeline_mode<synchronous>, transform_indices = @transform_2, window_bounds = array<i64: 9, 1, 256>}, {transform_indices = @transform_3, window_bounds = array<i64: 2, 8, 256>}]} {
    %c0 = arith.constant 0 : index
    %c0_0 = arith.constant 0 : index
    %0 = vector.load %arg2[%c0, %c0_0] : memref<8x37xf32, #tpu.memory_space<vmem>>, vector<8x37xf32>
    %c0_1 = arith.constant 0 : index
    %c0_2 = arith.constant 0 : index
    %c0_3 = arith.constant 0 : index
    %1 = vector.load %arg3[%c0_1, %c0_2, %c0_3] : memref<9x1x256xf32, #tpu.memory_space<vmem>>, vector<1x1x256xf32>
    %2 = vector.shape_cast %1 : vector<1x1x256xf32> to vector<1x256xf32>
    %c1 = arith.constant 1 : index
    %c0_4 = arith.constant 0 : index
    %c0_5 = arith.constant 0 : index
    %3 = vector.load %arg3[%c1, %c0_4, %c0_5] : memref<9x1x256xf32, #tpu.memory_space<vmem>>, vector<1x1x256xf32>
    %4 = vector.shape_cast %3 : vector<1x1x256xf32> to vector<1x256xf32>
    %c2 = arith.constant 2 : index
    %c0_6 = arith.constant 0 : index
    %c0_7 = arith.constant 0 : index
    %5 = vector.load %arg3[%c2, %c0_6, %c0_7] : memref<9x1x256xf32, #tpu.memory_space<vmem>>, vector<1x1x256xf32>
    %6 = vector.shape_cast %5 : vector<1x1x256xf32> to vector<1x256xf32>
    %c3 = arith.constant 3 : index
    %c0_8 = arith.constant 0 : index
    %c0_9 = arith.constant 0 : index
    %7 = vector.load %arg3[%c3, %c0_8, %c0_9] : memref<9x1x256xf32, #tpu.memory_space<vmem>>, vector<1x1x256xf32>
    %8 = vector.shape_cast %7 : vector<1x1x256xf32> to vector<1x256xf32>
    %c5 = arith.constant 5 : index
    %c0_10 = arith.constant 0 : index
    %c0_11 = arith.constant 0 : index
    %9 = vector.load %arg3[%c5, %c0_10, %c0_11] : memref<9x1x256xf32, #tpu.memory_space<vmem>>, vector<1x1x256xf32>
    %10 = vector.shape_cast %9 : vector<1x1x256xf32> to vector<1x256xf32>
    %c6 = arith.constant 6 : index
    %c0_12 = arith.constant 0 : index
    %c0_13 = arith.constant 0 : index
    %11 = vector.load %arg3[%c6, %c0_12, %c0_13] : memref<9x1x256xf32, #tpu.memory_space<vmem>>, vector<1x1x256xf32>
    %12 = vector.shape_cast %11 : vector<1x1x256xf32> to vector<1x256xf32>
    %c7 = arith.constant 7 : index
    %c0_14 = arith.constant 0 : index
    %c0_15 = arith.constant 0 : index
    %13 = vector.load %arg3[%c7, %c0_14, %c0_15] : memref<9x1x256xf32, #tpu.memory_space<vmem>>, vector<1x1x256xf32>
    %14 = vector.shape_cast %13 : vector<1x1x256xf32> to vector<1x256xf32>
    %c8 = arith.constant 8 : index
    %c0_16 = arith.constant 0 : index
    %c0_17 = arith.constant 0 : index
    %15 = vector.load %arg3[%c8, %c0_16, %c0_17] : memref<9x1x256xf32, #tpu.memory_space<vmem>>, vector<1x1x256xf32>
    %16 = vector.shape_cast %15 : vector<1x1x256xf32> to vector<1x256xf32>
    %cst = arith.constant 1.000000e+00 : f32
    %17 = vector.broadcast %cst : f32 to vector<1x256xf32>
    %c36 = arith.constant 36 : index
    %c0_18 = arith.constant 0 : index
    %18 = vector.load %arg5[%c36, %c0_18] : memref<37x256xf32, #tpu.memory_space<vmem>>, vector<1x256xf32>
    tpu.vector_store %arg5[%c36, %c0_18], %17 {strides = array<i32>} : memref<37x256xf32, #tpu.memory_space<vmem>>, vector<1x256xf32>,
    %c0_19 = arith.constant 0 : index
    %c0_20 = arith.constant 0 : index
    %c0_21 = arith.constant 0 : index
    %19 = vector.load %arg1[%c0_19, %c0_20, %c0_21] : memref<2x4x256xf32, #tpu.memory_space<vmem>>, vector<1x4x256xf32>
    %20 = vector.shape_cast %19 : vector<1x4x256xf32> to vector<4x256xf32>
    %c17_i32 = arith.constant 17 : i32
    %21 = tpu.dynamic_rotate %20 by %c17_i32 dim 1 : vector<4x256xf32>, i32 -> vector<4x256xf32>
    %22 = vector.broadcast %2 : vector<1x256xf32> to vector<4x256xf32>
    %23 = arith.mulf %21, %22 : vector<4x256xf32>
    %c0_22 = arith.constant 0 : index
    %c0_23 = arith.constant 0 : index
    %24 = vector.load %arg5[%c0_22, %c0_23] : memref<37x256xf32, #tpu.memory_space<vmem>>, vector<4x256xf32>
    tpu.vector_store %arg5[%c0_22, %c0_23], %23 {strides = array<i32>} : memref<37x256xf32, #tpu.memory_space<vmem>>, vector<4x256xf32>,
    %c16_i32 = arith.constant 16 : i32
    %25 = tpu.dynamic_rotate %20 by %c16_i32 dim 1 : vector<4x256xf32>, i32 -> vector<4x256xf32>
    %26 = vector.broadcast %4 : vector<1x256xf32> to vector<4x256xf32>
    %27 = arith.mulf %25, %26 : vector<4x256xf32>
    %c4 = arith.constant 4 : index
    %c0_24 = arith.constant 0 : index
    %28 = vector.load %arg5[%c4, %c0_24] : memref<37x256xf32, #tpu.memory_space<vmem>>, vector<4x256xf32>
    tpu.vector_store %arg5[%c4, %c0_24], %27 {strides = array<i32>} : memref<37x256xf32, #tpu.memory_space<vmem>>, vector<4x256xf32>,
    %c15_i32 = arith.constant 15 : i32
    %29 = tpu.dynamic_rotate %20 by %c15_i32 dim 1 : vector<4x256xf32>, i32 -> vector<4x256xf32>
    %30 = vector.broadcast %6 : vector<1x256xf32> to vector<4x256xf32>
    %31 = arith.mulf %29, %30 : vector<4x256xf32>
    %c8_25 = arith.constant 8 : index
    %c0_26 = arith.constant 0 : index
    %32 = vector.load %arg5[%c8_25, %c0_26] : memref<37x256xf32, #tpu.memory_space<vmem>>, vector<4x256xf32>
    tpu.vector_store %arg5[%c8_25, %c0_26], %31 {strides = array<i32>} : memref<37x256xf32, #tpu.memory_space<vmem>>, vector<4x256xf32>,
    %c1_i32 = arith.constant 1 : i32
    %33 = tpu.dynamic_rotate %20 by %c1_i32 dim 1 : vector<4x256xf32>, i32 -> vector<4x256xf32>
    %34 = vector.broadcast %8 : vector<1x256xf32> to vector<4x256xf32>
    %35 = arith.mulf %33, %34 : vector<4x256xf32>
    %c12 = arith.constant 12 : index
    %c0_27 = arith.constant 0 : index
    %36 = vector.load %arg5[%c12, %c0_27] : memref<37x256xf32, #tpu.memory_space<vmem>>, vector<4x256xf32>
    tpu.vector_store %arg5[%c12, %c0_27], %35 {strides = array<i32>} : memref<37x256xf32, #tpu.memory_space<vmem>>, vector<4x256xf32>,
    %c16 = arith.constant 16 : index
    %c0_28 = arith.constant 0 : index
    %37 = vector.load %arg5[%c16, %c0_28] : memref<37x256xf32, #tpu.memory_space<vmem>>, vector<4x256xf32>
    tpu.vector_store %arg5[%c16, %c0_28], %20 {strides = array<i32>} : memref<37x256xf32, #tpu.memory_space<vmem>>, vector<4x256xf32>,
    %c255_i32 = arith.constant 255 : i32
    %38 = tpu.dynamic_rotate %20 by %c255_i32 dim 1 : vector<4x256xf32>, i32 -> vector<4x256xf32>
    %39 = vector.broadcast %10 : vector<1x256xf32> to vector<4x256xf32>
    %40 = arith.mulf %38, %39 : vector<4x256xf32>
    %c20 = arith.constant 20 : index
    %c0_29 = arith.constant 0 : index
    %41 = vector.load %arg5[%c20, %c0_29] : memref<37x256xf32, #tpu.memory_space<vmem>>, vector<4x256xf32>
    tpu.vector_store %arg5[%c20, %c0_29], %40 {strides = array<i32>} : memref<37x256xf32, #tpu.memory_space<vmem>>, vector<4x256xf32>,
    %c241_i32 = arith.constant 241 : i32
    %42 = tpu.dynamic_rotate %20 by %c241_i32 dim 1 : vector<4x256xf32>, i32 -> vector<4x256xf32>
    %43 = vector.broadcast %12 : vector<1x256xf32> to vector<4x256xf32>
    %44 = arith.mulf %42, %43 : vector<4x256xf32>
    %c24 = arith.constant 24 : index
    %c0_30 = arith.constant 0 : index
    %45 = vector.load %arg5[%c24, %c0_30] : memref<37x256xf32, #tpu.memory_space<vmem>>, vector<4x256xf32>
    tpu.vector_store %arg5[%c24, %c0_30], %44 {strides = array<i32>} : memref<37x256xf32, #tpu.memory_space<vmem>>, vector<4x256xf32>,
    %c240_i32 = arith.constant 240 : i32
    %46 = tpu.dynamic_rotate %20 by %c240_i32 dim 1 : vector<4x256xf32>, i32 -> vector<4x256xf32>
    %47 = vector.broadcast %14 : vector<1x256xf32> to vector<4x256xf32>
    %48 = arith.mulf %46, %47 : vector<4x256xf32>
    %c28 = arith.constant 28 : index
    %c0_31 = arith.constant 0 : index
    %49 = vector.load %arg5[%c28, %c0_31] : memref<37x256xf32, #tpu.memory_space<vmem>>, vector<4x256xf32>
    tpu.vector_store %arg5[%c28, %c0_31], %48 {strides = array<i32>} : memref<37x256xf32, #tpu.memory_space<vmem>>, vector<4x256xf32>,
    %c239_i32 = arith.constant 239 : i32
    %50 = tpu.dynamic_rotate %20 by %c239_i32 dim 1 : vector<4x256xf32>, i32 -> vector<4x256xf32>
    %51 = vector.broadcast %16 : vector<1x256xf32> to vector<4x256xf32>
    %52 = arith.mulf %50, %51 : vector<4x256xf32>
    %c32 = arith.constant 32 : index
    %c0_32 = arith.constant 0 : index
    %53 = vector.load %arg5[%c32, %c0_32] : memref<37x256xf32, #tpu.memory_space<vmem>>, vector<4x256xf32>
    tpu.vector_store %arg5[%c32, %c0_32], %52 {strides = array<i32>} : memref<37x256xf32, #tpu.memory_space<vmem>>, vector<4x256xf32>,
    %c0_33 = arith.constant 0 : index
    %c0_34 = arith.constant 0 : index
    %54 = vector.load %arg5[%c0_33, %c0_34] : memref<37x256xf32, #tpu.memory_space<vmem>>, vector<37x256xf32>
    %cst_35 = arith.constant dense<0.000000e+00> : vector<8x256xf32>
    %55 = tpu.matmul %0, %54, %cst_35 {dimension_numbers = #tpu.dot_dimension_numbers<[1], [0], [0], [1], [0, 0, 1, 1], [], []>} : vector<8x37xf32>, vector<37x256xf32>, vector<8x256xf32> -> vector<8x256xf32>
    %c0_36 = arith.constant 0 : index
    %c0_37 = arith.constant 0 : index
    %c0_38 = arith.constant 0 : index
    %56 = vector.load %arg4[%c0_36, %c0_37, %c0_38] : memref<2x8x256xf32, #tpu.memory_space<vmem>>, vector<1x8x256xf32>
    %57 = vector.shape_cast %56 : vector<1x8x256xf32> to vector<8x256xf32>
    %58 = vector.shape_cast %55 : vector<8x256xf32> to vector<1x8x256xf32>
    tpu.vector_store %arg4[%c0_36, %c0_37, %c0_38], %58 {strides = array<i32>} : memref<2x8x256xf32, #tpu.memory_space<vmem>>, vector<1x8x256xf32>,
    %c1_39 = arith.constant 1 : index
    %c0_40 = arith.constant 0 : index
    %c0_41 = arith.constant 0 : index
    %59 = vector.load %arg1[%c1_39, %c0_40, %c0_41] : memref<2x4x256xf32, #tpu.memory_space<vmem>>, vector<1x4x256xf32>
    %60 = vector.shape_cast %59 : vector<1x4x256xf32> to vector<4x256xf32>
    %c17_i32_42 = arith.constant 17 : i32
    %61 = tpu.dynamic_rotate %60 by %c17_i32_42 dim 1 : vector<4x256xf32>, i32 -> vector<4x256xf32>
    %62 = vector.broadcast %2 : vector<1x256xf32> to vector<4x256xf32>
    %63 = arith.mulf %61, %62 : vector<4x256xf32>
    %c0_43 = arith.constant 0 : index
    %c0_44 = arith.constant 0 : index
    %64 = vector.load %arg5[%c0_43, %c0_44] : memref<37x256xf32, #tpu.memory_space<vmem>>, vector<4x256xf32>
    tpu.vector_store %arg5[%c0_43, %c0_44], %63 {strides = array<i32>} : memref<37x256xf32, #tpu.memory_space<vmem>>, vector<4x256xf32>,
    %c16_i32_45 = arith.constant 16 : i32
    %65 = tpu.dynamic_rotate %60 by %c16_i32_45 dim 1 : vector<4x256xf32>, i32 -> vector<4x256xf32>
    %66 = vector.broadcast %4 : vector<1x256xf32> to vector<4x256xf32>
    %67 = arith.mulf %65, %66 : vector<4x256xf32>
    %c4_46 = arith.constant 4 : index
    %c0_47 = arith.constant 0 : index
    %68 = vector.load %arg5[%c4_46, %c0_47] : memref<37x256xf32, #tpu.memory_space<vmem>>, vector<4x256xf32>
    tpu.vector_store %arg5[%c4_46, %c0_47], %67 {strides = array<i32>} : memref<37x256xf32, #tpu.memory_space<vmem>>, vector<4x256xf32>,
    %c15_i32_48 = arith.constant 15 : i32
    %69 = tpu.dynamic_rotate %60 by %c15_i32_48 dim 1 : vector<4x256xf32>, i32 -> vector<4x256xf32>
    %70 = vector.broadcast %6 : vector<1x256xf32> to vector<4x256xf32>
    %71 = arith.mulf %69, %70 : vector<4x256xf32>
    %c8_49 = arith.constant 8 : index
    %c0_50 = arith.constant 0 : index
    %72 = vector.load %arg5[%c8_49, %c0_50] : memref<37x256xf32, #tpu.memory_space<vmem>>, vector<4x256xf32>
    tpu.vector_store %arg5[%c8_49, %c0_50], %71 {strides = array<i32>} : memref<37x256xf32, #tpu.memory_space<vmem>>, vector<4x256xf32>,
    %c1_i32_51 = arith.constant 1 : i32
    %73 = tpu.dynamic_rotate %60 by %c1_i32_51 dim 1 : vector<4x256xf32>, i32 -> vector<4x256xf32>
    %74 = vector.broadcast %8 : vector<1x256xf32> to vector<4x256xf32>
    %75 = arith.mulf %73, %74 : vector<4x256xf32>
    %c12_52 = arith.constant 12 : index
    %c0_53 = arith.constant 0 : index
    %76 = vector.load %arg5[%c12_52, %c0_53] : memref<37x256xf32, #tpu.memory_space<vmem>>, vector<4x256xf32>
    tpu.vector_store %arg5[%c12_52, %c0_53], %75 {strides = array<i32>} : memref<37x256xf32, #tpu.memory_space<vmem>>, vector<4x256xf32>,
    %c16_54 = arith.constant 16 : index
    %c0_55 = arith.constant 0 : index
    %77 = vector.load %arg5[%c16_54, %c0_55] : memref<37x256xf32, #tpu.memory_space<vmem>>, vector<4x256xf32>
    tpu.vector_store %arg5[%c16_54, %c0_55], %60 {strides = array<i32>} : memref<37x256xf32, #tpu.memory_space<vmem>>, vector<4x256xf32>,
    %c255_i32_56 = arith.constant 255 : i32
    %78 = tpu.dynamic_rotate %60 by %c255_i32_56 dim 1 : vector<4x256xf32>, i32 -> vector<4x256xf32>
    %79 = vector.broadcast %10 : vector<1x256xf32> to vector<4x256xf32>
    %80 = arith.mulf %78, %79 : vector<4x256xf32>
    %c20_57 = arith.constant 20 : index
    %c0_58 = arith.constant 0 : index
    %81 = vector.load %arg5[%c20_57, %c0_58] : memref<37x256xf32, #tpu.memory_space<vmem>>, vector<4x256xf32>
    tpu.vector_store %arg5[%c20_57, %c0_58], %80 {strides = array<i32>} : memref<37x256xf32, #tpu.memory_space<vmem>>, vector<4x256xf32>,
    %c241_i32_59 = arith.constant 241 : i32
    %82 = tpu.dynamic_rotate %60 by %c241_i32_59 dim 1 : vector<4x256xf32>, i32 -> vector<4x256xf32>
    %83 = vector.broadcast %12 : vector<1x256xf32> to vector<4x256xf32>
    %84 = arith.mulf %82, %83 : vector<4x256xf32>
    %c24_60 = arith.constant 24 : index
    %c0_61 = arith.constant 0 : index
    %85 = vector.load %arg5[%c24_60, %c0_61] : memref<37x256xf32, #tpu.memory_space<vmem>>, vector<4x256xf32>
    tpu.vector_store %arg5[%c24_60, %c0_61], %84 {strides = array<i32>} : memref<37x256xf32, #tpu.memory_space<vmem>>, vector<4x256xf32>,
    %c240_i32_62 = arith.constant 240 : i32
    %86 = tpu.dynamic_rotate %60 by %c240_i32_62 dim 1 : vector<4x256xf32>, i32 -> vector<4x256xf32>
    %87 = vector.broadcast %14 : vector<1x256xf32> to vector<4x256xf32>
    %88 = arith.mulf %86, %87 : vector<4x256xf32>
    %c28_63 = arith.constant 28 : index
    %c0_64 = arith.constant 0 : index
    %89 = vector.load %arg5[%c28_63, %c0_64] : memref<37x256xf32, #tpu.memory_space<vmem>>, vector<4x256xf32>
    tpu.vector_store %arg5[%c28_63, %c0_64], %88 {strides = array<i32>} : memref<37x256xf32, #tpu.memory_space<vmem>>, vector<4x256xf32>,
    %c239_i32_65 = arith.constant 239 : i32
    %90 = tpu.dynamic_rotate %60 by %c239_i32_65 dim 1 : vector<4x256xf32>, i32 -> vector<4x256xf32>
    %91 = vector.broadcast %16 : vector<1x256xf32> to vector<4x256xf32>
    %92 = arith.mulf %90, %91 : vector<4x256xf32>
    %c32_66 = arith.constant 32 : index
    %c0_67 = arith.constant 0 : index
    %93 = vector.load %arg5[%c32_66, %c0_67] : memref<37x256xf32, #tpu.memory_space<vmem>>, vector<4x256xf32>
    tpu.vector_store %arg5[%c32_66, %c0_67], %92 {strides = array<i32>} : memref<37x256xf32, #tpu.memory_space<vmem>>, vector<4x256xf32>,
    %c0_68 = arith.constant 0 : index
    %c0_69 = arith.constant 0 : index
    %94 = vector.load %arg5[%c0_68, %c0_69] : memref<37x256xf32, #tpu.memory_space<vmem>>, vector<37x256xf32>
    %cst_70 = arith.constant dense<0.000000e+00> : vector<8x256xf32>
    %95 = tpu.matmul %0, %94, %cst_70 {dimension_numbers = #tpu.dot_dimension_numbers<[1], [0], [0], [1], [0, 0, 1, 1], [], []>} : vector<8x37xf32>, vector<37x256xf32>, vector<8x256xf32> -> vector<8x256xf32>
    %c1_71 = arith.constant 1 : index
    %c0_72 = arith.constant 0 : index
    %c0_73 = arith.constant 0 : index
    %96 = vector.load %arg4[%c1_71, %c0_72, %c0_73] : memref<2x8x256xf32, #tpu.memory_space<vmem>>, vector<1x8x256xf32>
    %97 = vector.shape_cast %96 : vector<1x8x256xf32> to vector<8x256xf32>
    %98 = vector.shape_cast %95 : vector<8x256xf32> to vector<1x8x256xf32>
    tpu.vector_store %arg4[%c1_71, %c0_72, %c0_73], %98 {strides = array<i32>} : memref<2x8x256xf32, #tpu.memory_space<vmem>>, vector<1x8x256xf32>,
    return
  }
  func.func @transform_0(%arg0: i32) -> (i32, i32, i32) {
    %c0_i32 = arith.constant 0 : i32
    %c0_i32_0 = arith.constant 0 : i32
    %c0_i32_1 = arith.constant 0 : i32
    return %arg0, %c0_i32, %c0_i32_0 : i32, i32, i32
  }
  func.func @transform_1(%arg0: i32) -> (i32, i32) {
    %c0_i32 = arith.constant 0 : i32
    %c0_i32_0 = arith.constant 0 : i32
    %c0_i32_1 = arith.constant 0 : i32
    return %c0_i32, %c0_i32_0 : i32, i32
  }
  func.func @transform_2(%arg0: i32) -> (i32, i32, i32) {
    %c0_i32 = arith.constant 0 : i32
    %c0_i32_0 = arith.constant 0 : i32
    %c0_i32_1 = arith.constant 0 : i32
    %c0_i32_2 = arith.constant 0 : i32
    return %c0_i32, %c0_i32_0, %c0_i32_1 : i32, i32, i32
  }
  func.func @transform_3(%arg0: i32) -> (i32, i32, i32) {
    %c0_i32 = arith.constant 0 : i32
    %c0_i32_0 = arith.constant 0 : i32
    %c0_i32_1 = arith.constant 0 : i32
    return %arg0, %c0_i32, %c0_i32_0 : i32, i32, i32
  }
}

</mosaic_0001>

<bundles_post_ra>
// kernel: tpu_custom_call.1
= control target key start
LH: loop header
LB: loop body
LE: loop exit
PB: predicated region body
PF: predicated region fallthrough
CT: control target
= control target key end

     0   :  { %8 = vsyncpa [#allocation4], 0  ;;  %s1014_s0 = inlined_call_operand.hbm [shape: f32[2,4,256], index: 0, kind: input, shape index: {}]   ;;  %s1015_s1 = inlined_call_operand.hbm [shape: f32[8,37], index: 1, kind: input, shape index: {}]   ;;  %s1016_s2 = inlined_call_operand.hbm [shape: f32[9,1,256], index: 2, kind: input, shape index: {}]   ;;  %s1017_s3 = inlined_call_operand.hbm [shape: f32[2,8,256], index: 3, kind: output, shape index: {}]  }
   0x1   :  { %9 = vsyncpa [#allocation7], 0 }
   0x2   :  { %10 = vsyncpa [#allocation5], 0  ;;  %s735_s12 = smov [#allocation6]   ;;  %s736_s14 = smov [#allocation3]  }
   0x3   :  { %s29_s13 = sshll.u32 %s735_s12, 4  ;;  %s16_s15 = sshll.u32 %s736_s14, 4  ;;  %s30_s13 = int_to_ptr.vmem [resolvable:$true] %s29_s13  ;;  %s774_s15 = int_to_ptr.vmem [resolvable:$true] %s16_s15 }
   0x4   :  { %s641_s18 = scalar_lea.hbm %s1015_s1, 128 }
   0x5   :  { %p642_p0 = scmp.ne.s32.totalorder %s1015_s1, %s641_s18  ;;  %p645_p1 = scmp.lt.u32.totalorder %s641_s18, %s1015_s1 }
   0x7   :  { %p647_p2 = pnand %p645_p1, %p642_p0 }
   0x9   :  { %650 = shalt.err (!%p647_p2)
}
   0xa   :  { %s651_s23 = scalar_lea.vmem %s30_s13, 128  ;;  %p656_p4 = scmp.lt.s32.totalorder %s30_s13, %s30_s13 }
   0xb   :  { %p652_p3 = scmp.ne.s32.totalorder %s30_s13, %s651_s23  ;;  %p657_p5 = scmp.lt.s32.totalorder %s651_s23, %s651_s23 }
   0xd   :  { %p658_p6 = por %p657_p5, %p656_p4 }
   0xf   :  { %p659_p7 = pnand %p658_p6, %p652_p3 }
  0x11   :  { %662 = shalt.err (!%p659_p7)
}
  0x12   :  { %32 = dma.hbm_to_vmem [thread:$0]  %s1015_s1, 128, %s30_s13, [#allocation7]  }
  0x13   :  { %s663_s28 = scalar_lea.hbm %s1014_s0, 256 }
  0x14   :  { %p664_p8 = scmp.ne.s32.totalorder %s1014_s0, %s663_s28  ;;  %p667_p9 = scmp.lt.u32.totalorder %s663_s28, %s1014_s0 }
  0x16   :  { %p669_p10 = pnand %p667_p9, %p664_p8 }
  0x18   :  { %672 = shalt.err (!%p669_p10)
}
  0x19   :  { %s673_s6 = scalar_lea.vmem %s774_s15, 256  ;;  %p678_p12 = scmp.lt.s32.totalorder %s774_s15, %s774_s15 }
  0x1a   :  { %p674_p11 = scmp.ne.s32.totalorder %s774_s15, %s673_s6  ;;  %p679_p13 = scmp.lt.s32.totalorder %s673_s6, %s673_s6 }
  0x1c   :  { %p680_p0 = por %p679_p13, %p678_p12 }
  0x1e   :  { %p681_p1 = pnand %p680_p0, %p674_p11 }
  0x20   :  { %684 = shalt.err (!%p681_p1)
}
  0x21   :  { %s737_s1 = smov 128   ;;  %s738_s7 = smov 8  }
  0x22   :  { %22 = dma.hbm_to_vmem [thread:$0]  %s1014_s0, 256, %s774_s15, [#allocation4], %s737_s1, %s737_s1, %s738_s7  }
  0x23   :  { %s739_s10 = smov [#allocation8]   ;;  %s685_s14 = scalar_lea.hbm %s1016_s2, 288 }
  0x24   :  { %s38_s11 = sshll.u32 %s739_s10, 4  ;;  %p686_p2 = scmp.ne.s32.totalorder %s1016_s2, %s685_s14  ;;  %s39_s11 = int_to_ptr.vmem [resolvable:$true] %s38_s11 }
  0x25   :  { %p689_p3 = scmp.lt.u32.totalorder %s685_s14, %s1016_s2 }
  0x27   :  { %p691_p4 = pnand %p689_p3, %p686_p2 }
  0x29   :  { %694 = shalt.err (!%p691_p4)
}
  0x2a   :  { %s695_s20 = scalar_lea.vmem %s39_s11, 288  ;;  %p700_p6 = scmp.lt.s32.totalorder %s39_s11, %s39_s11 }
  0x2b   :  { %p696_p5 = scmp.ne.s32.totalorder %s39_s11, %s695_s20  ;;  %p701_p7 = scmp.lt.s32.totalorder %s695_s20, %s695_s20 }
  0x2d   :  { %p702_p8 = por %p701_p7, %p700_p6 }
  0x2f   :  { %p703_p9 = pnand %p702_p8, %p696_p5 }
  0x31   :  { %706 = shalt.err (!%p703_p9)
}
  0x32   :  { %s740_s0 = smov 32   ;;  %s741_s15 = smov 2  }
  0x33   :  { %44 = dma.hbm_to_vmem [thread:$0]  %s1016_s2, 288, %s39_s11, [#allocation7], %s740_s0, %s740_s0, %s741_s15  }
  0x34   :  { %729 = dma.done.wait [#allocation4], 256  }
  0x35   :  { %730 = vsyncadd [#allocation4], 4294967040 }
  0x36   :  { %731 = dma.done.wait [#allocation7], 416  }
  0x37   :  { %732 = vsyncadd [#allocation7], 4294966880  ;;  %v77_v0 = vld [vmem:[#allocation3] sm:$0xff]  ;;  %s742_s23 = smov 1   ;;  %s743_s24 = smov 16   ;;  %v819_v2 = vld [vmem:[#allocation3 + $0x8] sm:$0xff]  ;;  %v70_v4 = vlaneseq }
  0x38   :  { %155 = vrot.lane.b32.xlu1 %v77_v0, %s742_s23  ;;  %183 = vst [vmem:[#allocation2 + $0x20] sm:$0xf] %v77_v0  ;;  %105 = vrot.lane.b32.xlu0 %v77_v0, %s743_s24  ;;  %v79_v1 = vcombine.high %v77_v0, %v77_v0  ;;  %s744_s25 = smov 17   ;;  %s745_s2 = smov 15   ;;  %v823_v3 = vcombine.high %v819_v2, %v819_v2  ;;  %v749_v5 = vmov 1.0   ;;  %v751_v6 = vmov 0.0  }
  0x39   :  { %s746_s26 = smov 127   ;;  %s747_s27 = smov 112   ;;  %vm72_vm0 = vcmp.lt.s32.totalorder %v70_v4, 256  ;;  %370 = vmatprep.mubr.f32.mxu0 %v751_v6  ;;  %570 = vmatprep.mubr.f32.mxu1 %v751_v6  ;;  %v92_v7 = vshrl.u32 %v70_v4, 7  ;;  %v843_v8 = vand.u32 127, %v70_v4  ;;  %vm299_vm9 = vcmask 1044480  }
  0x3a   :  { %184 = vst [vmem:[#allocation2 + $0x28] sm:$0xf] %v79_v1  ;;  %s748_s28 = smov 113   ;;  %75 = vst.msk [vmem:[#allocation2 + $0x44] ss:$8 sm:$0x3] %vm72_vm0, %v749_v5 }
  0x3b   :  { %s750_s29 = smov 111   ;;  %v845_v9 = vsub.s32 0, %v92_v7  ;;  %v847_v10 = vsub.s32 1, %v92_v7  ;;  %v61_v11 = vld [vmem:[#allocation8 + $0x6] sm:$0x3]  ;;  %vm159_vm1 = vcmp.lt.s32.totalorder %v843_v8, 1 }
  0x3c   :  { %81 = vrot.lane.b32.xlu0 %v77_v0, %s744_s25  ;;  %157 = vrot.lane.b32.xlu1 %v79_v1, %s742_s23  ;;  %v55_v16 = vld [vmem:[#allocation8] sm:$0x3]  ;;  %v57_v17 = vld [vmem:[#allocation8 + $0x2] sm:$0x3]  ;;  %vm87_vm2 = vcmp.lt.s32.totalorder %v843_v8, 17  ;;  %vm109_vm3 = vcmp.lt.s32.totalorder %v843_v8, 16 }
  0x3d   :  { %v851_v14 = vrot.slane %v61_v11, %v845_v9  ;;  %v854_v15 = vrot.slane %v61_v11, %v847_v10  ;;  %v863_v22 = vrot.slane %v55_v16, %v845_v9  ;;  %v866_v23 = vrot.slane %v55_v16, %v847_v10  ;;  %v59_v24 = vld [vmem:[#allocation8 + $0x4] sm:$0x3]  ;;  %v63_v43 = vld [vmem:[#allocation8 + $0xa] sm:$0x3]  ;;  %v67_v54 = vld [vmem:[#allocation8 + $0xe] sm:$0x3] }
  0x3e   :  { %v871_v27 = vrot.slane %v57_v17, %v845_v9  ;;  %v874_v28 = vrot.slane %v57_v17, %v847_v10  ;;  %vm137_vm4 = vcmp.lt.s32.totalorder %v843_v8, 15  ;;  %v878_v33 = vrot.slane %v59_v24, %v845_v9  ;;  %v65_v63 = vld [vmem:[#allocation8 + $0xc] sm:$0x3]  ;;  %s752_s30 = smov [#allocation9]  }
  0x3f   :  { %v881_v34 = vrot.slane %v59_v24, %v847_v10  ;;  %vm189_vm5 = vcmp.lt.s32.totalorder %v843_v8, 127  ;;  %v903_v52 = vrot.slane %v63_v43, %v845_v9  ;;  %v906_v53 = vrot.slane %v63_v43, %v847_v10  ;;  %s585_s4 = sshll.u32 %s752_s30, 4  ;;  %s586_s4 = int_to_ptr.vmem [resolvable:$true] %s585_s4 }
  0x40   :  { %83 = vrot.lane.b32.xlu1 %v79_v1, %s744_s25  ;;  %107 = vrot.lane.b32.xlu0 %v79_v1, %s743_s24  ;;  %vm239_vm6 = vcmp.lt.s32.totalorder %v843_v8, 112  ;;  %v916_v61 = vrot.slane %v67_v54, %v845_v9  ;;  %v919_v62 = vrot.slane %v67_v54, %v847_v10  ;;  %vm217_vm7 = vcmp.lt.s32.totalorder %v843_v8, 113  ;;  %s707_s5 = scalar_lea.vmem %s586_s4, 512  ;;  %p712_p11 = scmp.lt.s32.totalorder %s586_s4, %s586_s4 }
  0x41   :  { %v932_v16 = vrot.slane %v65_v63, %v847_v10  ;;  %vm267_vm8 = vcmp.lt.s32.totalorder %v843_v8, 111  ;;  %vm295_vm10 = vcmask 302080   ;;  %p708_p10 = scmp.ne.s32.totalorder %s586_s4, %s707_s5  ;;  %p713_p12 = scmp.lt.s32.totalorder %s707_s5, %s707_s5 }
  0x43   :  { %p714_p13 = por %p713_p12, %p712_p11 }
  0x44   :  { %135 = vrot.lane.b32.xlu1 %v79_v1, %s745_s2  ;;  %133 = vrot.lane.b32.xlu0 %v77_v0, %s745_s2 }
  0x45   :  { %p715_p0 = pnand %p714_p13, %p708_p10 }
  0x48   :  { %187 = vrot.lane.b32.xlu1 %v79_v1, %s746_s26  ;;  %185 = vrot.lane.b32.xlu0 %v77_v0, %s746_s26 }
  0x4c   :  { %237 = vrot.lane.b32.xlu1 %v79_v1, %s747_s27  ;;  %235 = vrot.lane.b32.xlu0 %v77_v0, %s747_s27 }
  0x50   :  { %215 = vrot.lane.b32.xlu1 %v79_v1, %s748_s28  ;;  %213 = vrot.lane.b32.xlu0 %v77_v0, %s748_s28 }
  0x54   :  { %396 = vrot.lane.b32.xlu1 %v823_v3, %s743_s24  ;;  %394 = vrot.lane.b32.xlu0 %v819_v2, %s743_s24 }
  0x58   :  { %422 = vrot.lane.b32.xlu1 %v823_v3, %s742_s23  ;;  %420 = vrot.lane.b32.xlu0 %v819_v2, %s742_s23 }
  0x5c   :  { %386 = vrot.lane.b32.xlu1 %v823_v3, %s744_s25  ;;  %384 = vrot.lane.b32.xlu0 %v819_v2, %s744_s25 }
  0x60   :  { %412 = vrot.lane.b32.xlu1 %v823_v3, %s745_s2  ;;  %410 = vrot.lane.b32.xlu0 %v819_v2, %s745_s2 }
  0x64   :  { %265 = vrot.lane.b32.xlu1 %v79_v1, %s750_s29  ;;  %263 = vrot.lane.b32.xlu0 %v77_v0, %s750_s29 }
  0x68   :  { %440 = vrot.lane.b32.xlu1 %v823_v3, %s746_s26  ;;  %438 = vrot.lane.b32.xlu0 %v819_v2, %s746_s26 }
  0x6c   :  { %466 = vrot.lane.b32.xlu1 %v823_v3, %s747_s27  ;;  %464 = vrot.lane.b32.xlu0 %v819_v2, %s747_s27 }
  0x70   :  { %456 = vrot.lane.b32.xlu1 %v823_v3, %s748_s28  ;;  %454 = vrot.lane.b32.xlu0 %v819_v2, %s748_s28 }
  0x74   :  { %482 = vrot.lane.b32.xlu1 %v823_v3, %s750_s29  ;;  %480 = vrot.lane.b32.xlu0 %v819_v2, %s750_s29 }
  0xaa   :  { %v156_v12 = vpop.permute.xlu1 %155  ;;  %v106_v13 = vpop.permute.xlu0 %105 }
  0xae   :  { %v82_v18 = vpop.permute.xlu0 %81  ;;  %v158_v19 = vpop.permute.xlu1 %157 }
  0xaf   :  { %v160_v20 = vsel %vm159_vm1, %v156_v12, %v158_v19  ;;  %v161_v21 = vsel %vm159_vm1, %v158_v19, %v156_v12 }
  0xb0   :  { %v173_v25 = vmul.f32 %v851_v14, %v161_v21  ;;  %v174_v26 = vmul.f32 %v854_v15, %v160_v20 }
  0xb2   :  { %v177_v29 = vrot.slane %v173_v25, 4  ;;  %v178_v30 = vrot.slane %v174_v26, 4  ;;  %v84_v31 = vpop.permute.xlu1 %83  ;;  %v108_v32 = vpop.permute.xlu0 %107 }
  0xb3   :  { %v88_v35 = vsel %vm87_vm2, %v82_v18, %v84_v31  ;;  %v89_v36 = vsel %vm87_vm2, %v84_v31, %v82_v18  ;;  %v110_v37 = vsel %vm109_vm3, %v106_v13, %v108_v32  ;;  %v111_v38 = vsel %vm109_vm3, %v108_v32, %v106_v13 }
  0xb4   :  { %181 = vst [vmem:[#allocation2 + $0x10] sm:$0xf0] %v177_v29  ;;  %182 = vst [vmem:[#allocation2 + $0x18] sm:$0xf0] %v178_v30  ;;  %v101_v39 = vmul.f32 %v863_v22, %v89_v36  ;;  %v102_v40 = vmul.f32 %v866_v23, %v88_v35  ;;  %v123_v41 = vmul.f32 %v871_v27, %v111_v38 }
  0xb5   :  { %v124_v42 = vmul.f32 %v874_v28, %v110_v37  ;;  %v929_v13 = vrot.slane %v65_v63, %v845_v9  ;;  %v69_v63 = vld [vmem:[#allocation8 + $0x10] sm:$0x3] }
  0xb6   :  { %103 = vst [vmem:[#allocation2] sm:$0xf] %v101_v39  ;;  %104 = vst [vmem:[#allocation2 + $0x8] sm:$0xf] %v102_v40  ;;  %v127_v44 = vrot.slane %v123_v41, 4  ;;  %v136_v46 = vpop.permute.xlu1 %135  ;;  %v134_v47 = vpop.permute.xlu0 %133 }
  0xb7   :  { %v128_v45 = vrot.slane %v124_v42, 4  ;;  %v138_v48 = vsel %vm137_vm4, %v134_v47, %v136_v46  ;;  %v139_v49 = vsel %vm137_vm4, %v136_v46, %v134_v47 }
  0xb8   :  { %131 = vst [vmem:[#allocation2] sm:$0xf0] %v127_v44  ;;  %v151_v50 = vmul.f32 %v878_v33, %v139_v49  ;;  %v152_v51 = vmul.f32 %v881_v34, %v138_v48 }
  0xb9   :  { %132 = vst [vmem:[#allocation2 + $0x8] sm:$0xf0] %v128_v45 }
  0xba   :  { %153 = vst [vmem:[#allocation2 + $0x10] sm:$0xf] %v151_v50  ;;  %154 = vst [vmem:[#allocation2 + $0x18] sm:$0xf] %v152_v51  ;;  %v188_v55 = vpop.permute.xlu1 %187  ;;  %v186_v56 = vpop.permute.xlu0 %185 }
  0xbb   :  { %v190_v57 = vsel %vm189_vm5, %v186_v56, %v188_v55  ;;  %v191_v58 = vsel %vm189_vm5, %v188_v55, %v186_v56 }
  0xbc   :  { %v203_v59 = vmul.f32 %v903_v52, %v190_v57  ;;  %v204_v60 = vmul.f32 %v906_v53, %v191_v58 }
  0xbe   :  { %v207_v0 = vrot.slane %v203_v59, 4  ;;  %v208_v1 = vrot.slane %v204_v60, 4  ;;  %v238_v4 = vpop.permute.xlu1 %237  ;;  %v236_v5 = vpop.permute.xlu0 %235 }
  0xbf   :  { %v240_v6 = vsel %vm239_vm6, %v236_v5, %v238_v4  ;;  %v241_v7 = vsel %vm239_vm6, %v238_v4, %v236_v5  ;;  %v285_v19 = vld [vmem:[#allocation2] sm:$0xff] }
  0xc0   :  { %211 = vst [vmem:[#allocation2 + $0x20] sm:$0xf0] %v207_v0  ;;  %212 = vst [vmem:[#allocation2 + $0x28] sm:$0xf0] %v208_v1  ;;  %v253_v11 = vmul.f32 %v916_v61, %v240_v6  ;;  %v254_v12 = vmul.f32 %v919_v62, %v241_v7  ;;  %v286_v17 = vld [vmem:[#allocation2 + $0x8] sm:$0xff]  ;;  %v278_v7 = vrot.slane %v69_v63, %v847_v10 }
  0xc1   :  { %v288_v18 = vld [vmem:[#allocation2 + $0x18] sm:$0xff]  ;;  %v287_v20 = vld [vmem:[#allocation2 + $0x10] sm:$0xff] }
  0xc2   :  { %v257_v21 = vrot.slane %v253_v11, 4  ;;  %v258_v24 = vrot.slane %v254_v12, 4  ;;  %v216_v25 = vpop.permute.xlu1 %215  ;;  %v214_v26 = vpop.permute.xlu0 %213  ;;  %v604_v29 = vpack.c.bf16 %v288_v18, %v286_v17  ;;  %v606_v30 = vpack.c.bf16 %v287_v20, %v285_v19 }
  0xc3   :  { %v218_v31 = vsel %vm217_vm7, %v214_v26, %v216_v25  ;;  %v219_v32 = vsel %vm217_vm7, %v216_v25, %v214_v26 }
  0xc4   :  { %261 = vst [vmem:[#allocation2 + $0x30] sm:$0xf0] %v257_v21  ;;  %262 = vst [vmem:[#allocation2 + $0x38] sm:$0xf0] %v258_v24  ;;  %v231_v35 = vmul.f32 %v929_v13, %v218_v31  ;;  %v232_v36 = vmul.f32 %v932_v16, %v219_v32  ;;  %605 = vmatprep.subr.bf16.mxu0 %v604_v29 }
  0xc5   :  { %607 = vmatpush1.bf16.msra.mxu0 %v606_v30 }
  0xc6   :  { %233 = vst [vmem:[#allocation2 + $0x30] sm:$0xf] %v231_v35  ;;  %234 = vst [vmem:[#allocation2 + $0x38] sm:$0xf] %v232_v36  ;;  %v397_v37 = vpop.permute.xlu1 %396  ;;  %v395_v38 = vpop.permute.xlu0 %394 }
  0xc7   :  { %v398_v39 = vsel %vm109_vm3, %v395_v38, %v397_v37  ;;  %v399_v40 = vsel %vm109_vm3, %v397_v37, %v395_v38  ;;  %v290_v41 = vld [vmem:[#allocation2 + $0x28] sm:$0xff]  ;;  %v289_v42 = vld [vmem:[#allocation2 + $0x20] sm:$0xff] }
  0xc8   :  { %v400_v43 = vmul.f32 %v399_v40, %v871_v27  ;;  %v401_v44 = vmul.f32 %v398_v39, %v874_v28  ;;  %437 = vst [vmem:[#allocation2 + $0x28] sm:$0xf] %v823_v3  ;;  %436 = vst [vmem:[#allocation2 + $0x20] sm:$0xf] %v819_v2 }
  0xca   :  { %v404_v45 = vrot.slane %v400_v43, 4  ;;  %v405_v46 = vrot.slane %v401_v44, 4  ;;  %v423_v47 = vpop.permute.xlu1 %422  ;;  %v421_v48 = vpop.permute.xlu0 %420  ;;  %v54_v43 = vld [vmem:[#allocation6] sm:$0xff] }
  0xcb   :  { %v424_v49 = vsel %vm159_vm1, %v421_v48, %v423_v47  ;;  %v425_v50 = vsel %vm159_vm1, %v423_v47, %v421_v48 }
  0xcc   :  { %408 = vst [vmem:[#allocation2] sm:$0xf0] %v404_v45  ;;  %409 = vst [vmem:[#allocation2 + $0x8] sm:$0xf0] %v405_v46  ;;  %v426_v27 = vmul.f32 %v425_v50, %v851_v14  ;;  %v427_v28 = vmul.f32 %v424_v49, %v854_v15 }
  0xcd   :  { %v292_v51 = vld [vmem:[#allocation2 + $0x38] sm:$0xff]  ;;  %v291_v3 = vld [vmem:[#allocation2 + $0x30] sm:$0xff] }
  0xce   :  { %v430_v54 = vrot.slane %v426_v27, 4  ;;  %v431_v2 = vrot.slane %v427_v28, 4  ;;  %v387_v55 = vpop.permute.xlu1 %386  ;;  %v385_v56 = vpop.permute.xlu0 %384  ;;  %v608_v57 = vpack.c.bf16 %v292_v51, %v290_v41  ;;  %v610_v58 = vpack.c.bf16 %v291_v3, %v289_v42 }
  0xcf   :  { %v388_v59 = vsel %vm87_vm2, %v385_v56, %v387_v55  ;;  %v389_v60 = vsel %vm87_vm2, %v387_v55, %v385_v56 }
  0xd0   :  { %434 = vst [vmem:[#allocation2 + $0x10] sm:$0xf0] %v430_v54  ;;  %435 = vst [vmem:[#allocation2 + $0x18] sm:$0xf0] %v431_v2  ;;  %v390_v14 = vmul.f32 %v389_v60, %v863_v22  ;;  %v391_v15 = vmul.f32 %v388_v59, %v866_v23  ;;  %609 = vmatprep.subr.bf16.mxu0 %v608_v57  ;;  %v274_v23 = vrot.slane %v69_v63, %v845_v9 }
  0xd1   :  { %611 = vmatpush1.bf16.msra.mxu0 %v610_v58 }
  0xd2   :  { %392 = vst [vmem:[#allocation2] sm:$0xf] %v390_v14  ;;  %393 = vst [vmem:[#allocation2 + $0x8] sm:$0xf] %v391_v15  ;;  %v413_v0 = vpop.permute.xlu1 %412  ;;  %v411_v1 = vpop.permute.xlu0 %410 }
  0xd3   :  { %v414_v4 = vsel %vm137_vm4, %v411_v1, %v413_v0  ;;  %v415_v5 = vsel %vm137_vm4, %v413_v0, %v411_v1 }
  0xd4   :  { %v416_v6 = vmul.f32 %v415_v5, %v878_v33  ;;  %v417_v22 = vmul.f32 %v414_v4, %v881_v34 }
  0xd6   :  { %418 = vst [vmem:[#allocation2 + $0x10] sm:$0xf] %v416_v6  ;;  %419 = vst [vmem:[#allocation2 + $0x18] sm:$0xf] %v417_v22  ;;  %v266_v11 = vpop.permute.xlu1 %265  ;;  %v264_v12 = vpop.permute.xlu0 %263 }
  0xd7   :  { %v268_v17 = vsel %vm267_vm8, %v264_v12, %v266_v11  ;;  %v269_v18 = vsel %vm267_vm8, %v266_v11, %v264_v12 }
  0xd8   :  { %v281_v19 = vmul.f32 %v274_v23, %v268_v17  ;;  %v282_v20 = vmul.f32 %v278_v7, %v269_v18 }
  0xd9   :  { %v491_v25 = vld [vmem:[#allocation2 + $0x8] sm:$0xff]  ;;  %v490_v29 = vld [vmem:[#allocation2] sm:$0xff] }
  0xda   :  { %283 = vst [vmem:[#allocation2 + $0x40] sm:$0xf] %v281_v19  ;;  %284 = vst [vmem:[#allocation2 + $0x48] sm:$0xf] %v282_v20  ;;  %v441_v33 = vpop.permute.xlu1 %440  ;;  %v439_v34 = vpop.permute.xlu0 %438 }
  0xdb   :  { %v442_v9 = vsel %vm189_vm5, %v439_v34, %v441_v33  ;;  %v443_v10 = vsel %vm189_vm5, %v441_v33, %v439_v34 }
  0xdc   :  { %v444_v21 = vmul.f32 %v442_v9, %v903_v52  ;;  %v445_v24 = vmul.f32 %v443_v10, %v906_v53 }
  0xdd   :  { %v493_v26 = vld [vmem:[#allocation2 + $0x18] sm:$0xff]  ;;  %v492_v30 = vld [vmem:[#allocation2 + $0x10] sm:$0xff] }
  0xde   :  { %v448_v31 = vrot.slane %v444_v21, 4  ;;  %v449_v32 = vrot.slane %v445_v24, 4  ;;  %v467_v35 = vpop.permute.xlu1 %466  ;;  %v465_v36 = vpop.permute.xlu0 %464  ;;  %v612_v37 = vpack.c.bf16 %v493_v26, %v491_v25  ;;  %v614_v38 = vpack.c.bf16 %v492_v30, %v490_v29 }
  0xdf   :  { %v468_v39 = vsel %vm239_vm6, %v465_v36, %v467_v35  ;;  %v469_v40 = vsel %vm239_vm6, %v467_v35, %v465_v36 }
  0xe0   :  { %452 = vst [vmem:[#allocation2 + $0x20] sm:$0xf0] %v448_v31  ;;  %453 = vst [vmem:[#allocation2 + $0x28] sm:$0xf0] %v449_v32  ;;  %v470_v52 = vmul.f32 %v468_v39, %v916_v61  ;;  %v471_v53 = vmul.f32 %v469_v40, %v919_v62  ;;  %613 = vmatprep.subr.bf16.mxu1 %v612_v37 }
  0xe1   :  { %615 = vmatpush1.bf16.msra.mxu1 %v614_v38  ;;  %v294_v41 = vld [vmem:[#allocation2 + $0x48] sm:$0x1f]  ;;  %v293_v42 = vld [vmem:[#allocation2 + $0x40] sm:$0x1f] }
  0xe2   :  { %v474_v44 = vrot.slane %v470_v52, 4  ;;  %v475_v45 = vrot.slane %v471_v53, 4  ;;  %v457_v46 = vpop.permute.xlu1 %456  ;;  %v455_v47 = vpop.permute.xlu0 %454  ;;  %598 = vmatprep.subr.msk.mxu0 %vm299_vm9, %v294_v41 }
  0xe3   :  { %v458_v48 = vsel %vm217_vm7, %v455_v47, %v457_v46  ;;  %v459_v61 = vsel %vm217_vm7, %v457_v46, %v455_v47  ;;  %599 = vmatpush1.msk.msra.mxu0 %vm299_vm9, %v293_v42 }
  0xe4   :  { %478 = vst [vmem:[#allocation2 + $0x30] sm:$0xf0] %v474_v44  ;;  %479 = vst [vmem:[#allocation2 + $0x38] sm:$0xf0] %v475_v45  ;;  %v460_v62 = vmul.f32 %v458_v48, %v929_v13  ;;  %v461_v49 = vmul.f32 %v459_v61, %v932_v16  ;;  %600 = vmatmul.mubr.msk.f32.vlgmr.msra.gmra.mrb[0].mxu0 %vm295_vm10, %v54_v43 }
  0xe6   :  { %462 = vst [vmem:[#allocation2 + $0x30] sm:$0xf] %v460_v62  ;;  %463 = vst [vmem:[#allocation2 + $0x38] sm:$0xf] %v461_v49  ;;  %v483_v50 = vpop.permute.xlu1 %482  ;;  %v481_v27 = vpop.permute.xlu0 %480 }
  0xe7   :  { %v484_v28 = vsel %vm267_vm8, %v481_v27, %v483_v50  ;;  %v485_v51 = vsel %vm267_vm8, %v483_v50, %v481_v27  ;;  %v495_v2 = vld [vmem:[#allocation2 + $0x28] sm:$0xff]  ;;  %v494_v55 = vld [vmem:[#allocation2 + $0x20] sm:$0xff] }
  0xe8   :  { %v486_v3 = vmul.f32 %v484_v28, %v274_v23  ;;  %v487_v54 = vmul.f32 %v485_v51, %v278_v7 }
  0xea   :  { %488 = vst [vmem:[#allocation2 + $0x40] sm:$0xf] %v486_v3  ;;  %489 = vst [vmem:[#allocation2 + $0x48] sm:$0xf] %v487_v54 }
  0xed   :  { %v497_v13 = vld [vmem:[#allocation2 + $0x38] sm:$0xff]  ;;  %v496_v16 = vld [vmem:[#allocation2 + $0x30] sm:$0xff] }
  0xee   :  { %v616_v56 = vpack.c.bf16 %v497_v13, %v495_v2  ;;  %v618_v57 = vpack.c.bf16 %v496_v16, %v494_v55 }
  0xf0   :  { %617 = vmatprep.subr.bf16.mxu1 %v616_v56 }
  0xf1   :  { %619 = vmatpush1.bf16.msra.mxu1 %v618_v57  ;;  %v499_v58 = vld [vmem:[#allocation2 + $0x48] sm:$0x1f]  ;;  %v498_v59 = vld [vmem:[#allocation2 + $0x40] sm:$0x1f] }
  0xf2   :  { %601 = vmatprep.subr.msk.mxu1 %vm299_vm9, %v499_v58 }
  0xf5   :  { %602 = vmatpush1.msk.msra.mxu1 %vm299_vm9, %v498_v59 }
  0xf6   :  { %603 = vmatmul.mubr.msk.f32.vlgmr.msra.gmra.mrb[0].mxu1 %vm295_vm10, %v54_v43 }
 0x1b7   :  { %v372_v8 = vpop.f32.mrb[0].mxu0 }
 0x1b8   :  { %377 = vst [vmem:[#allocation9] sm:$0xff] %v372_v8  ;;  %v374_v60 = vpop.f32.mrb[1].mxu0 }
 0x1b9   :  { %378 = vst [vmem:[#allocation9 + $0x8] sm:$0xff] %v374_v60 }
 0x1c9   :  { %v572_v14 = vpop.f32.mrb[0].mxu1 }
 0x1ca   :  { %578 = vst [vmem:[#allocation9 + $0x10] sm:$0xff] %v572_v14  ;;  %v574_v15 = vpop.f32.mrb[1].mxu1 }
 0x1cb   :  { %579 = vst [vmem:[#allocation9 + $0x18] sm:$0xff] %v574_v15 }
 0x1cc   :  { %718 = shalt.err (!%p715_p0)
}
 0x1cd   :  { %s719_s7 = scalar_lea.hbm %s1017_s3, 512 }
 0x1ce   :  { %p720_p1 = scmp.ne.s32.totalorder %s1017_s3, %s719_s7  ;;  %p723_p2 = scmp.lt.u32.totalorder %s719_s7, %s1017_s3 }
 0x1d0   :  { %p725_p3 = pnand %p723_p2, %p720_p1 }
 0x1d2   :  { %728 = shalt.err (!%p725_p3)
}
 0x1d3   :  { %s753_s12 = smov 256  }
 0x1d4   :  { %591 = dma.vmem_to_hbm [thread:$0]  %s586_s4, 512, %s1017_s3, [#allocation5], %s753_s12, %s753_s12, %s743_s24  }
 0x1d5   :  { %733 = dma.done.wait [#allocation5], 512  }
 0x1d6   :  { %734 = vsyncadd [#allocation5], 4294966784 }
 0x1d7   :  { %595 = vsyncpa [#allocation4], 1 }
 0x1d8   :  { %596 = vsyncpa [#allocation7], 1 }
 0x1d9   :  { %597 = vsyncpa [#allocation5], 1 }

</bundles_post_ra>
